<compile_context>
chip_gen: v6e
topology: v6e:2x2x1
jax: 0.10.0
libtpu: 0.0.40
codegen_flags: <defaults>
</compile_context>

<pallas_src>
import jax
import jax.numpy as jnp
from jax.experimental import pallas as pl
from jax.experimental.pallas import tpu as pltpu

EPS = 1e-5
PAD_ROWS = 8  # zero rows added above/below the upsampled image (sublane aligned)


def _interp_matrix(n_in, n_out):
    """(n_out, n_in) linear interpolation matrix for align_corners=True."""
    dst = jnp.arange(n_out, dtype=jnp.float32)
    src = dst * (n_in - 1) / (n_out - 1)
    lo = jnp.clip(jnp.floor(src).astype(jnp.int32), 0, n_in - 2)
    frac = src - lo.astype(jnp.float32)
    rows = jnp.arange(n_out)
    mat = jnp.zeros((n_out, n_in), jnp.float32)
    mat = mat.at[rows, lo].add(1.0 - frac)
    mat = mat.at[rows, lo + 1].add(frac)
    return mat


def expansive_block_forward(x, conv_w, conv_b, gamma, beta):
    n_batch, cin, h, w = x.shape
    cout = conv_w.shape[0]
    hout, wout = 2 * h, 2 * w
    hw = hout * wout
    hpad = hout + 2 * PAD_ROWS

    # ------------------------- host-side constant prep -------------------------
    ah = _interp_matrix(h, hout)                      # (Hout, H)   row interp
    awt = _interp_matrix(w, wout).T                   # (W, Wout)   col interp (T)
    # Block-diagonal column-interp matrix: upsamples all channels in ONE matmul.
    # (Fine for small Cin; at real U-Net widths use per-channel-group matmuls.)
    awt_bd = jnp.kron(jnp.eye(cin, dtype=jnp.float32), awt)      # (Cin*W, Cin*Wout)
    # x transposed so the row interp is a single (Hout,H)@(H,Cin*W) matmul.
    xt = jnp.transpose(x.astype(jnp.float32), (0, 2, 1, 3)).reshape(n_batch, h, cin * w)

    # Conv weights for the im2col matmul: column index = (dy*3+dx)*Cin + c.
    wmat = jnp.transpose(conv_w.astype(jnp.float32), (0, 2, 3, 1)).reshape(cout, 9 * cin)
    bias2 = conv_b.astype(jnp.float32).reshape(cout, 1)
    gamma2 = gamma.astype(jnp.float32).reshape(cout, 1)
    beta2 = beta.astype(jnp.float32).reshape(cout, 1)

    # Lane masks zeroing the taps that would wrap across image rows in the
    # flattened layout (those positions are the conv's horizontal zero padding).
    lane = jnp.arange(hw, dtype=jnp.int32)
    lmask = (lane % wout != 0).astype(jnp.float32).reshape(1, hw)
    rmask = (lane % wout != wout - 1).astype(jnp.float32).reshape(1, hw)

    # --------------- kernel 1: bilinear upsample (2 MXU matmuls) ---------------
    def upsample_kernel(xt_ref, ah_ref, awtbd_ref, up_ref):
        # whole block zeroed -> padding rows are zero; interior overwritten below
        up_ref[...] = jnp.zeros_like(up_ref)
        u1 = jnp.dot(ah_ref[...], xt_ref[0],
                     preferred_element_type=jnp.float32)          # (Hout, Cin*W)
        uw = jnp.dot(u1, awtbd_ref[...],
                     preferred_element_type=jnp.float32)          # (Hout, Cin*Wout)
        for c in range(cin):
            up_ref[0, c, PAD_ROWS:PAD_ROWS + hout, :] = uw[:, c * wout:(c + 1) * wout]

    up = pl.pallas_call(
        upsample_kernel,
        out_shape=jax.ShapeDtypeStruct((n_batch, cin, hpad, wout), jnp.float32),
        grid_spec=pltpu.PrefetchScalarGridSpec(
            num_scalar_prefetch=0,
            grid=(n_batch,),
            in_specs=[
                pl.BlockSpec((1, h, cin * w), lambda i: (i, 0, 0)),
                pl.BlockSpec((hout, h), lambda i: (0, 0)),
                pl.BlockSpec((cin * w, cin * wout), lambda i: (0, 0)),
            ],
            out_specs=pl.BlockSpec((1, cin, hpad, wout), lambda i: (i, 0, 0, 0)),
        ),
        compiler_params=pltpu.CompilerParams(dimension_semantics=("parallel",)),
    )(xt, ah, awt_bd)

    # Free bitcast reshape: the conv kernel reads the upsample row-flattened so
    # every 3x3 tap becomes a contiguous lane-window slice (DMA does the relayout).
    up_flat = up.reshape(n_batch, cin, hpad * wout)

    # ---- kernel 2: 3x3 conv (single im2col MXU matmul) + bias + ReLU + BN -----
    def conv_bn_kernel(up_ref, w_ref, b_ref, g_ref, bt_ref, lm_ref, rm_ref,
                       out_ref, sums_ref, sqs_ref):
        n = pl.program_id(0)

        @pl.when(n == 0)
        def _init():
            sums_ref[...] = jnp.zeros_like(sums_ref)
            sqs_ref[...] = jnp.zeros_like(sqs_ref)

        taps = []
        for dy in range(3):
            for dx in range(3):
                s = (PAD_ROWS + dy - 1) * wout + (dx - 1)
                p = up_ref[0, :, s:s + hw]                        # (Cin, HW)
                if dx == 0:
                    p = p * lm_ref[...]
                elif dx == 2:
                    p = p * rm_ref[...]
                taps.append(p)
        patches = jnp.concatenate(taps, axis=0)                   # (9*Cin, HW)
        conv = jnp.dot(w_ref[...], patches,
                       preferred_element_type=jnp.float32)        # (Cout, HW)
        y = jnp.maximum(conv + b_ref[...], 0.0)                   # bias + ReLU

        out_ref[n] = y                                            # lane-dense store
        sums_ref[...] += y
        sqs_ref[...] += y * y

        @pl.when(n == n_batch - 1)
        def _finalize():
            # Batch statistics (biased variance), then normalize the resident
            # output block in place.  f32 E[x^2]-E[x]^2 is fine at these scales.
            inv_cnt = 1.0 / float(n_batch * hw)
            mean = jnp.sum(sums_ref[...], axis=1, keepdims=True) * inv_cnt
            var = jnp.sum(sqs_ref[...], axis=1, keepdims=True) * inv_cnt - mean * mean
            inv_std = jax.lax.rsqrt(var + EPS)
            scale = g_ref[...] * inv_std                          # (Cout, 1)
            shift = bt_ref[...] - mean * scale
            out_ref[...] = out_ref[...] * scale[None, :, :] + shift[None, :, :]

    out_flat = pl.pallas_call(
        conv_bn_kernel,
        out_shape=jax.ShapeDtypeStruct((n_batch, cout, hw), jnp.float32),
        grid_spec=pltpu.PrefetchScalarGridSpec(
            num_scalar_prefetch=0,
            grid=(n_batch,),
            in_specs=[
                pl.BlockSpec((1, cin, hpad * wout), lambda i: (i, 0, 0)),
                pl.BlockSpec((cout, 9 * cin), lambda i: (0, 0)),
                pl.BlockSpec((cout, 1), lambda i: (0, 0)),
                pl.BlockSpec((cout, 1), lambda i: (0, 0)),
                pl.BlockSpec((cout, 1), lambda i: (0, 0)),
                pl.BlockSpec((1, hw), lambda i: (0, 0)),
                pl.BlockSpec((1, hw), lambda i: (0, 0)),
            ],
            out_specs=pl.BlockSpec((n_batch, cout, hw), lambda i: (0, 0, 0)),
            scratch_shapes=[
                pltpu.VMEM((cout, hw), jnp.float32),
                pltpu.VMEM((cout, hw), jnp.float32),
            ],
        ),
        compiler_params=pltpu.CompilerParams(dimension_semantics=("arbitrary",)),
    )(up_flat, wmat, bias2, gamma2, beta2, lmask, rmask)

    return out_flat.reshape(n_batch, cout, hout, wout)


def reference_forward(x, conv_w, conv_b, gamma, beta):
    a_h = _interp_matrix(x.shape[2], 2 * x.shape[2])
    a_w = _interp_matrix(x.shape[3], 2 * x.shape[3])
    up = jnp.einsum('ph,nchw,qw->ncpq', a_h, x, a_w)
    conv = jax.lax.conv_general_dilated(
        up, conv_w, window_strides=(1, 1), padding=((1, 1), (1, 1)),
        dimension_numbers=('NCHW', 'OIHW', 'NCHW'))
    r = jnp.maximum(conv + conv_b[None, :, None, None], 0.0)
    mean = r.mean(axis=(0, 2, 3))
    var = r.var(axis=(0, 2, 3))
    xn = (r - mean[None, :, None, None]) * jax.lax.rsqrt(var[None, :, None, None] + EPS)
    return gamma[None, :, None, None] * xn + beta[None, :, None, None]


if __name__ == "__main__":
    N, CIN, COUT, H, W = 2, 4, 8, 16, 16

    key = jax.random.PRNGKey(0)
    kx, kw, kb = jax.random.split(key, 3)
    x = jax.random.normal(kx, (N, CIN, H, W), dtype=jnp.float32)
    conv_w = 0.1 * jax.random.normal(kw, (COUT, CIN, 3, 3), dtype=jnp.float32)
    conv_b = 0.1 * jax.random.normal(kb, (COUT,), dtype=jnp.float32)
    gamma = 1.0 + 0.1 * jnp.arange(COUT, dtype=jnp.float32)
    beta = 0.01 * jnp.arange(COUT, dtype=jnp.float32)

    out = jax.block_until_ready(
        expansive_block_forward(x, conv_w, conv_b, gamma, beta))
    ref = jax.block_until_ready(
        reference_forward(x, conv_w, conv_b, gamma, beta))

    assert out.shape == (N, COUT, 2 * H, 2 * W), out.shape
    # 2e-2 tolerance: MXU f32 matmuls use default (bf16-pass) precision on both
    # the kernel and the XLA reference path; logic errors would be O(0.1+).
    if not bool(jnp.allclose(out, ref, atol=2e-2, rtol=2e-2)):
        raise AssertionError("Pallas output does not match reference")
    print("KERNEL_OK")
</pallas_src>

<mosaic_0001>
module attributes {stable_mosaic.version = 11 : i64} {
  func.func @upsample_kernel(%arg0: i32, %arg1: memref<1x16x64xf32, #tpu.memory_space<vmem>>, %arg2: memref<32x16xf32, #tpu.memory_space<vmem>>, %arg3: memref<64x128xf32, #tpu.memory_space<vmem>>, %arg4: memref<1x4x48x32xf32, #tpu.memory_space<vmem>>) attributes {dimension_semantics = [#tpu.dimension_semantics<parallel>], iteration_bounds = array<i64: 2>, scalar_prefetch = 0 : i64, scratch_operands = 0 : i64, tpu.core_type = #tpu.core_type<tc>, window_params = [{transform_indices = @transform_0, window_bounds = array<i64: 1, 16, 64>}, {pipeline_mode = #tpu.pipeline_mode<synchronous>, transform_indices = @transform_1, window_bounds = array<i64: 32, 16>}, {pipeline_mode = #tpu.pipeline_mode<synchronous>, transform_indices = @transform_2, window_bounds = array<i64: 64, 128>}, {transform_indices = @transform_3, window_bounds = array<i64: 1, 4, 48, 32>}]} {
    %cst = arith.constant 0.000000e+00 : f32
    %0 = vector.broadcast %cst : f32 to vector<1x4x48x32xf32>
    %c0 = arith.constant 0 : index
    %c0_0 = arith.constant 0 : index
    %c0_1 = arith.constant 0 : index
    %c0_2 = arith.constant 0 : index
    %1 = vector.load %arg4[%c0, %c0_0, %c0_1, %c0_2] : memref<1x4x48x32xf32, #tpu.memory_space<vmem>>, vector<1x4x48x32xf32>
    tpu.vector_store %arg4[%c0, %c0_0, %c0_1, %c0_2], %0 {strides = array<i32>} : memref<1x4x48x32xf32, #tpu.memory_space<vmem>>, vector<1x4x48x32xf32>,
    %c0_3 = arith.constant 0 : index
    %c0_4 = arith.constant 0 : index
    %2 = vector.load %arg2[%c0_3, %c0_4] : memref<32x16xf32, #tpu.memory_space<vmem>>, vector<32x16xf32>
    %c0_5 = arith.constant 0 : index
    %c0_6 = arith.constant 0 : index
    %c0_7 = arith.constant 0 : index
    %3 = vector.load %arg1[%c0_5, %c0_6, %c0_7] : memref<1x16x64xf32, #tpu.memory_space<vmem>>, vector<1x16x64xf32>
    %4 = vector.shape_cast %3 : vector<1x16x64xf32> to vector<16x64xf32>
    %cst_8 = arith.constant dense<0.000000e+00> : vector<32x64xf32>
    %5 = tpu.matmul %2, %4, %cst_8 {dimension_numbers = #tpu.dot_dimension_numbers<[1], [0], [0], [1], [0, 0, 1, 1], [], []>} : vector<32x16xf32>, vector<16x64xf32>, vector<32x64xf32> -> vector<32x64xf32>
    %c0_9 = arith.constant 0 : index
    %c0_10 = arith.constant 0 : index
    %6 = vector.load %arg3[%c0_9, %c0_10] : memref<64x128xf32, #tpu.memory_space<vmem>>, vector<64x128xf32>
    %cst_11 = arith.constant dense<0.000000e+00> : vector<32x128xf32>
    %7 = tpu.matmul %5, %6, %cst_11 {dimension_numbers = #tpu.dot_dimension_numbers<[1], [0], [0], [1], [0, 0, 1, 1], [], []>} : vector<32x64xf32>, vector<64x128xf32>, vector<32x128xf32> -> vector<32x128xf32>
    %8 = vector.extract_strided_slice %7 {offsets = [0, 0], sizes = [32, 32], strides = [1, 1]} : vector<32x128xf32> to vector<32x32xf32>
    %c0_12 = arith.constant 0 : index
    %c0_13 = arith.constant 0 : index
    %c8 = arith.constant 8 : index
    %c0_14 = arith.constant 0 : index
    %9 = vector.load %arg4[%c0_12, %c0_13, %c8, %c0_14] : memref<1x4x48x32xf32, #tpu.memory_space<vmem>>, vector<1x1x32x32xf32>
    %10 = vector.shape_cast %9 : vector<1x1x32x32xf32> to vector<32x32xf32>
    %11 = vector.shape_cast %8 : vector<32x32xf32> to vector<1x1x32x32xf32>
    tpu.vector_store %arg4[%c0_12, %c0_13, %c8, %c0_14], %11 {strides = array<i32>} : memref<1x4x48x32xf32, #tpu.memory_space<vmem>>, vector<1x1x32x32xf32>,
    %12 = vector.extract_strided_slice %7 {offsets = [0, 32], sizes = [32, 32], strides = [1, 1]} : vector<32x128xf32> to vector<32x32xf32>
    %c0_15 = arith.constant 0 : index
    %c1 = arith.constant 1 : index
    %c8_16 = arith.constant 8 : index
    %c0_17 = arith.constant 0 : index
    %13 = vector.load %arg4[%c0_15, %c1, %c8_16, %c0_17] : memref<1x4x48x32xf32, #tpu.memory_space<vmem>>, vector<1x1x32x32xf32>
    %14 = vector.shape_cast %13 : vector<1x1x32x32xf32> to vector<32x32xf32>
    %15 = vector.shape_cast %12 : vector<32x32xf32> to vector<1x1x32x32xf32>
    tpu.vector_store %arg4[%c0_15, %c1, %c8_16, %c0_17], %15 {strides = array<i32>} : memref<1x4x48x32xf32, #tpu.memory_space<vmem>>, vector<1x1x32x32xf32>,
    %16 = vector.extract_strided_slice %7 {offsets = [0, 64], sizes = [32, 32], strides = [1, 1]} : vector<32x128xf32> to vector<32x32xf32>
    %c0_18 = arith.constant 0 : index
    %c2 = arith.constant 2 : index
    %c8_19 = arith.constant 8 : index
    %c0_20 = arith.constant 0 : index
    %17 = vector.load %arg4[%c0_18, %c2, %c8_19, %c0_20] : memref<1x4x48x32xf32, #tpu.memory_space<vmem>>, vector<1x1x32x32xf32>
    %18 = vector.shape_cast %17 : vector<1x1x32x32xf32> to vector<32x32xf32>
    %19 = vector.shape_cast %16 : vector<32x32xf32> to vector<1x1x32x32xf32>
    tpu.vector_store %arg4[%c0_18, %c2, %c8_19, %c0_20], %19 {strides = array<i32>} : memref<1x4x48x32xf32, #tpu.memory_space<vmem>>, vector<1x1x32x32xf32>,
    %20 = vector.extract_strided_slice %7 {offsets = [0, 96], sizes = [32, 32], strides = [1, 1]} : vector<32x128xf32> to vector<32x32xf32>
    %c0_21 = arith.constant 0 : index
    %c3 = arith.constant 3 : index
    %c8_22 = arith.constant 8 : index
    %c0_23 = arith.constant 0 : index
    %21 = vector.load %arg4[%c0_21, %c3, %c8_22, %c0_23] : memref<1x4x48x32xf32, #tpu.memory_space<vmem>>, vector<1x1x32x32xf32>
    %22 = vector.shape_cast %21 : vector<1x1x32x32xf32> to vector<32x32xf32>
    %23 = vector.shape_cast %20 : vector<32x32xf32> to vector<1x1x32x32xf32>
    tpu.vector_store %arg4[%c0_21, %c3, %c8_22, %c0_23], %23 {strides = array<i32>} : memref<1x4x48x32xf32, #tpu.memory_space<vmem>>, vector<1x1x32x32xf32>,
    return
  }
  func.func @transform_0(%arg0: i32) -> (i32, i32, i32) {
    %c0_i32 = arith.constant 0 : i32
    %c0_i32_0 = arith.constant 0 : i32
    %c0_i32_1 = arith.constant 0 : i32
    return %arg0, %c0_i32, %c0_i32_0 : i32, i32, i32
  }
  func.func @transform_1(%arg0: i32) -> (i32, i32) {
    %c0_i32 = arith.constant 0 : i32
    %c0_i32_0 = arith.constant 0 : i32
    %c0_i32_1 = arith.constant 0 : i32
    return %c0_i32, %c0_i32_0 : i32, i32
  }
  func.func @transform_2(%arg0: i32) -> (i32, i32) {
    %c0_i32 = arith.constant 0 : i32
    %c0_i32_0 = arith.constant 0 : i32
    %c0_i32_1 = arith.constant 0 : i32
    return %c0_i32, %c0_i32_0 : i32, i32
  }
  func.func @transform_3(%arg0: i32) -> (i32, i32, i32, i32) {
    %c0_i32 = arith.constant 0 : i32
    %c0_i32_0 = arith.constant 0 : i32
    %c0_i32_1 = arith.constant 0 : i32
    %c0_i32_2 = arith.constant 0 : i32
    return %arg0, %c0_i32, %c0_i32_0, %c0_i32_1 : i32, i32, i32, i32
  }
}

</mosaic_0001>

<bundles_post_ra>
// kernel: tpu_custom_call.1
= control target key start
LH: loop header
LB: loop body
LE: loop exit
PB: predicated region body
PF: predicated region fallthrough
CT: control target
= control target key end

     0   :  { %8 = vsyncpa [#allocation3], 0  ;;  %s721_s12 = smov 0   ;;  %s854_s0 = inlined_call_operand.vmem [shape: f32[2,16,64], index: 0, kind: input, shape index: {}]   ;;  %s855_s1 = inlined_call_operand.vmem [shape: f32[32,16], index: 1, kind: input, shape index: {}]   ;;  %s856_s2 = inlined_call_operand.hbm [shape: f32[64,128], index: 2, kind: input, shape index: {}]   ;;  %s857_s3 = inlined_call_operand.vmem [shape: f32[2,4,48,32], index: 3, kind: output, shape index: {}]  }
   0x1 LB: > { %s547_s13 = sadd.s32 4294967295, %s692_s12   ;;  %p549_p0 = scmp.ge.s32.totalorder %s692_s12, 1  ;;  %s692_s12 = sphi %s721_s12, %s14_s12  }
   0x2   : > { %p113_p1 = scmp.lt.s32.totalorder %s692_s12, 3  ;;  %s694_s14 = smov [#allocation2]  }
   0x3   : > { %s128_s15 = sshll.u32 %s694_s14, 4  ;;  %p639_p3 = scmp.eq.s32.totalorder %s547_s13, 0  ;;  %s129_s15 = int_to_ptr.vmem [resolvable:$true] %s128_s15 }
   0x4   : > { %p729_p2 = pnand %p549_p0, %p113_p1  ;;  %s667_s17 = scalar_lea.vmem %s129_s15, 1024 }
   0x5   : > { %p668_p7 = scmp.ne.s32.totalorder %s129_s15, %s667_s17  ;;  %p675_p10 = scmp.lt.s32.totalorder %s129_s15, %s129_s15 }
   0x6   : > { %p635_p4 = pneg %p729_p2  ;;  %p676_p11 = scmp.lt.s32.totalorder %s667_s17, %s667_s17 }
   0x8   : > { %p636_p5 = pnand %p639_p3, %p635_p4  ;;  %p677_p12 = por %p676_p11, %p675_p10 }
   0xa   : > { %p658_p6 = pneg %p636_p5 }
   0xc   : > { %p670_p8 = pnand %p668_p7, %p658_p6 }
   0xe   : > { %p671_p9 = pneg %p670_p8 }
  0x10   : > { %p678_p13 = pnand %p677_p12, %p671_p9 }
  0x12   : > { %681 = shalt.err (!%p678_p13)
}
  0x13   : > { %s695_s18 = smov 128   ;;  %s696_s19 = smov 8  }
  0x14   : > { %638 = dma.hbm_to_vmem [thread:$0]  (!%p636_p5), %s856_s2, 1024, %s129_s15, [#allocation3], %s695_s18, %s695_s18, %s696_s19  }
  0x15   : > { %152 = sbr.rel (%p729_p2) target bundleno = 562 (0x232), region = 32 }
  0x1a   : > { %687 = dma.done.wait (%p639_p3), [#allocation3], 1024  }
  0x1b   : > { %689 = vsyncadd (%p639_p3), [#allocation3], 4294966272  ;;  %p176_p0 = scmp.lt.s32.totalorder %s547_s13, 1  ;;  %vm217_vm0 = vcmask 130048   ;;  %v211_v2 = vld [vmem:[%s855_s1] sm:$0xff]  ;;  %v212_v3 = vld [vmem:[%s855_s1 + $0x8] sm:$0xff] }
  0x1c   : > { %602 = vmatprep.mubr.msk.f32.mxu0 %vm217_vm0, %v211_v2  ;;  %v322_v4 = vld [vmem:[#allocation2 + $0x38] sm:$0xff]  ;;  %v321_v5 = vld [vmem:[#allocation2 + $0x30] sm:$0xff]  ;;  %v320_v7 = vld [vmem:[#allocation2 + $0x28] sm:$0xff]  ;;  %vm186_vm1 = vcmask 261120   ;;  %v697_v14 = vmov 0.0   ;;  %vm323_vm2 = vcmask 523264  }
  0x1d   : > { %s860_s13 = smov (!%p176_p0, %s547_s13), 1  ;;  %v213_v6 = vld [vmem:[%s855_s1 + $0x10] sm:$0xff]  ;;  %608 = vmatprep.subr.mxu1 %v322_v4  ;;  %v214_v8 = vld [vmem:[%s855_s1 + $0x18] sm:$0xff]  ;;  %v319_v9 = vld [vmem:[#allocation2 + $0x20] sm:$0xff]  ;;  %s698_s11 = smov 64  }
  0x1e   : > { %s579_s22 = sshll.u32 %s860_s13, 4  ;;  %609 = vmatpush3.msra.mxu1 %v322_v4  ;;  %v318_v10 = vld [vmem:[#allocation2 + $0x18] sm:$0xff]  ;;  %v317_v11 = vld [vmem:[#allocation2 + $0x10] sm:$0xff]  ;;  %v316_v12 = vld [vmem:[#allocation2 + $0x8] sm:$0xff]  ;;  %s630_s7 = smul.u32 192, %s860_s13 }
  0x1f   : > { %s180_s25 = scalar_lea.vmem %s854_s0, %s579_s22  ;;  %610 = vmatprep.subr.mxu1 %v321_v5  ;;  %v315_v13 = vld [vmem:[#allocation2] sm:$0xff]  ;;  %s699_s13 = smov 96  }
  0x20   : > { %v216_v0 = vld [vmem:[%s180_s25 + $0x8] sm:$0xff]  ;;  %v215_v1 = vld [vmem:[%s180_s25] sm:$0xff]  ;;  %611 = vmatpush3.msra.mxu1 %v321_v5  ;;  %s769_s10 = scalar_lea.vmem %s857_s3, %s630_s7  ;;  %s700_s14 = smov 32  }
  0x21   : > { %598 = vmatprep.subr.mxu0 %v216_v0  ;;  %612 = vmatprep.subr.mxu1 %v320_v7  ;;  %187 = vst.msk [vmem:[%s769_s10] sm:$0xff] %vm186_vm1, %v697_v14  ;;  %189 = vst.msk [vmem:[%s769_s10 + $0x10] sm:$0xff] %vm186_vm1, %v697_v14 }
  0x22   : > { %599 = vmatpush3.msra.mxu0 %v216_v0  ;;  %613 = vmatpush3.msra.mxu1 %v320_v7  ;;  %192 = vst.msk [vmem:[%s769_s10 + $0x28] sm:$0xff] %vm186_vm1, %v697_v14  ;;  %193 = vst.msk [vmem:[%s769_s10 + $0x30] sm:$0xff] %vm186_vm1, %v697_v14 }
  0x23   : > { %600 = vmatprep.subr.mxu0 %v215_v1  ;;  %614 = vmatprep.subr.mxu1 %v319_v9  ;;  %198 = vst.msk [vmem:[%s769_s10 + $0x58] sm:$0xff] %vm186_vm1, %v697_v14  ;;  %199 = vst.msk [vmem:[%s769_s10 + $0x60] sm:$0xff] %vm186_vm1, %v697_v14 }
  0x24   : > { %601 = vmatpush3.msra.mxu0 %v215_v1  ;;  %615 = vmatpush3.msra.mxu1 %v319_v9  ;;  %204 = vst.msk [vmem:[%s769_s10 + $0x88] sm:$0xff] %vm186_vm1, %v697_v14  ;;  %205 = vst.msk [vmem:[%s769_s10 + $0x90] sm:$0xff] %vm186_vm1, %v697_v14 }
  0x25   : > { %603 = vmatmul.mubr.msk.f32.vlgmr.msra.gmra.mxu0 %vm217_vm0, %v212_v3  ;;  %616 = vmatprep.subr.mxu1 %v318_v10  ;;  %210 = vst.msk [vmem:[%s769_s10 + $0xb8] sm:$0xff] %vm186_vm1, %v697_v14  ;;  %188 = vst.msk [vmem:[%s769_s10 + $0x8] sm:$0xff] %vm186_vm1, %v697_v14 }
  0x26   : > { %605 = vmatprep.mubr.msk.f32.mxu0 %vm217_vm0, %v213_v6  ;;  %617 = vmatpush3.msra.mxu1 %v318_v10  ;;  %190 = vst.msk [vmem:[%s769_s10 + $0x18] sm:$0xff] %vm186_vm1, %v697_v14  ;;  %191 = vst.msk [vmem:[%s769_s10 + $0x20] sm:$0xff] %vm186_vm1, %v697_v14 }
  0x27   : > { %618 = vmatprep.subr.mxu1 %v317_v11  ;;  %194 = vst.msk [vmem:[%s769_s10 + $0x38] sm:$0xff] %vm186_vm1, %v697_v14  ;;  %195 = vst.msk [vmem:[%s769_s10 + $0x40] sm:$0xff] %vm186_vm1, %v697_v14 }
  0x28   : > { %619 = vmatpush3.msra.mxu1 %v317_v11  ;;  %196 = vst.msk [vmem:[%s769_s10 + $0x48] sm:$0xff] %vm186_vm1, %v697_v14  ;;  %197 = vst.msk [vmem:[%s769_s10 + $0x50] sm:$0xff] %vm186_vm1, %v697_v14 }
  0x29   : > { %606 = vmatmul.mubr.msk.f32.gmra.mxu0 %vm217_vm0, %v214_v8  ;;  %620 = vmatprep.subr.mxu1 %v316_v12  ;;  %200 = vst.msk [vmem:[%s769_s10 + $0x68] sm:$0xff] %vm186_vm1, %v697_v14  ;;  %201 = vst.msk [vmem:[%s769_s10 + $0x70] sm:$0xff] %vm186_vm1, %v697_v14 }
  0x2a   : > { %621 = vmatpush3.msra.mxu1 %v316_v12  ;;  %202 = vst.msk [vmem:[%s769_s10 + $0x78] sm:$0xff] %vm186_vm1, %v697_v14  ;;  %203 = vst.msk [vmem:[%s769_s10 + $0x80] sm:$0xff] %vm186_vm1, %v697_v14 }
  0x2b   : > { %622 = vmatprep.subr.mxu1 %v315_v13  ;;  %206 = vst.msk [vmem:[%s769_s10 + $0x98] sm:$0xff] %vm186_vm1, %v697_v14  ;;  %207 = vst.msk [vmem:[%s769_s10 + $0xa0] sm:$0xff] %vm186_vm1, %v697_v14 }
  0x2c   : > { %623 = vmatpush3.msra.mxu1 %v315_v13  ;;  %208 = vst.msk [vmem:[%s769_s10 + $0xa8] sm:$0xff] %vm186_vm1, %v697_v14  ;;  %209 = vst.msk [vmem:[%s769_s10 + $0xb0] sm:$0xff] %vm186_vm1, %v697_v14 }
  0xe5   : > { %v604_v15 = vpop.f32.mrf.mxu0 }
  0xe7   : > { %v296_v16 = vpop.f32.mrf.mxu0 }
  0xe8   : > { %624 = vmatprep.mubr.msk.f32.mxu1 %vm323_vm2, %v296_v16 }
  0xe9   : > { %v607_v17 = vpop.f32.mrf.mxu0  ;;  %625 = vmatmul.mubr.msk.f32.vlgmr.msra.gmra.mxu1 %vm323_vm2, %v604_v15 }
  0xeb   : > { %v306_v18 = vpop.f32.mrf.mxu0 }
  0xec   : > { %627 = vmatprep.mubr.msk.f32.mxu1 %vm323_vm2, %v306_v18 }
  0xed   : > { %628 = vmatmul.mubr.msk.f32.gmra.mxu1 %vm323_vm2, %v607_v17 }
 0x1a9   : > { %v626_v19 = vpop.f32.mrf.mxu1 }
 0x1aa   : > { %422 = vst.msk [vmem:[%s769_s10 + $0x10] sm:$0xff] %vm186_vm1, %v626_v19  ;;  %448 = vrot.lane.b32.xlu1 %v626_v19, %s698_s11  ;;  %431 = vrot.lane.b32.xlu0 %v626_v19, %s699_s13 }
 0x1ab   : > { %v402_v20 = vpop.f32.mrf.mxu1 }
 0x1ac   : > { %421 = vst.msk [vmem:[%s769_s10 + $0x8] sm:$0xff] %vm186_vm1, %v402_v20 }
 0x1ad   : > { %v629_v21 = vpop.f32.mrf.mxu1 }
 0x1ae   : > { %424 = vst.msk [vmem:[%s769_s10 + $0x20] sm:$0xff] %vm186_vm1, %v629_v21  ;;  %465 = vrot.lane.b32.xlu1 %v626_v19, %s700_s14  ;;  %429 = vrot.lane.b32.xlu0 %v402_v20, %s699_s13 }
 0x1af   : > { %v412_v22 = vpop.f32.mrf.mxu1 }
 0x1b0   : > { %423 = vst.msk [vmem:[%s769_s10 + $0x18] sm:$0xff] %vm186_vm1, %v412_v22 }
 0x1b2   : > { %446 = vrot.lane.b32.xlu0 %v402_v20, %s698_s11  ;;  %435 = vrot.lane.b32.xlu1 %v629_v21, %s699_s13 }
 0x1b6   : > { %463 = vrot.lane.b32.xlu0 %v402_v20, %s700_s14  ;;  %452 = vrot.lane.b32.xlu1 %v629_v21, %s698_s11 }
 0x1ba   : > { %450 = vrot.lane.b32.xlu0 %v412_v22, %s698_s11  ;;  %433 = vrot.lane.b32.xlu1 %v412_v22, %s699_s13 }
 0x1be   : > { %467 = vrot.lane.b32.xlu0 %v412_v22, %s700_s14  ;;  %469 = vrot.lane.b32.xlu1 %v629_v21, %s700_s14 }
 0x21c   : > { %v449_v23 = vpop.permute.xlu1 %448  ;;  %v432_v24 = vpop.permute.xlu0 %431 }
 0x21d   : > { %570 = vst.msk [vmem:[%s769_s10 + $0x70] sm:$0xff] %vm186_vm1, %v449_v23  ;;  %566 = vst.msk [vmem:[%s769_s10 + $0x40] sm:$0xff] %vm186_vm1, %v432_v24 }
 0x220   : > { %v466_v25 = vpop.permute.xlu1 %465  ;;  %v430_v26 = vpop.permute.xlu0 %429 }
 0x221   : > { %574 = vst.msk [vmem:[%s769_s10 + $0xa0] sm:$0xff] %vm186_vm1, %v466_v25  ;;  %565 = vst.msk [vmem:[%s769_s10 + $0x38] sm:$0xff] %vm186_vm1, %v430_v26 }
 0x224   : > { %v447_v27 = vpop.permute.xlu0 %446  ;;  %v436_v28 = vpop.permute.xlu1 %435 }
 0x225   : > { %569 = vst.msk [vmem:[%s769_s10 + $0x68] sm:$0xff] %vm186_vm1, %v447_v27  ;;  %568 = vst.msk [vmem:[%s769_s10 + $0x50] sm:$0xff] %vm186_vm1, %v436_v28 }
 0x228   : > { %v464_v29 = vpop.permute.xlu0 %463  ;;  %v453_v30 = vpop.permute.xlu1 %452 }
 0x229   : > { %573 = vst.msk [vmem:[%s769_s10 + $0x98] sm:$0xff] %vm186_vm1, %v464_v29  ;;  %572 = vst.msk [vmem:[%s769_s10 + $0x80] sm:$0xff] %vm186_vm1, %v453_v30 }
 0x22c   : > { %v451_v31 = vpop.permute.xlu0 %450  ;;  %v434_v32 = vpop.permute.xlu1 %433 }
 0x22d   : > { %571 = vst.msk [vmem:[%s769_s10 + $0x78] sm:$0xff] %vm186_vm1, %v451_v31  ;;  %567 = vst.msk [vmem:[%s769_s10 + $0x48] sm:$0xff] %vm186_vm1, %v434_v32 }
 0x230   : > { %v468_v33 = vpop.permute.xlu0 %467  ;;  %v470_v34 = vpop.permute.xlu1 %469 }
 0x231   : > { %575 = vst.msk [vmem:[%s769_s10 + $0xa8] sm:$0xff] %vm186_vm1, %v468_v33  ;;  %576 = vst.msk [vmem:[%s769_s10 + $0xb0] sm:$0xff] %vm186_vm1, %v470_v34 }
 0x232 PF: > { %s14_s12 = sadd.s32 1, %s692_s12  }
 0x233   : > { %p11_p1 = scmp.ge.s32.totalorder %s14_s12, 4  }
 0x235   :  { %13 = sbr.rel (!%p11_p1) target bundleno = 1 (0x1), region = 70 }
 0x23a   :  { %501 = vsyncpa [#allocation3], 1 }
 0x23b   :  { %503 = vsyncpa [#allocation3 + $0x1], 1 }

</bundles_post_ra>
